<compile_context>
chip_gen: v7x
topology: tpu7x:2x2x1
jax: 0.10.0
libtpu: 0.0.40
codegen_flags: <defaults>
</compile_context>

<pallas_src>
import math
import functools

import jax
import jax.numpy as jnp
from jax.experimental import pallas as pl
from jax.experimental.pallas import tpu as pltpu


def _mha_kernel(xq_ref, xk_ref, xv_ref,
                wq_ref, bq_ref, wk_ref, bk_ref, wv_ref, bv_ref,
                wo_ref, bo_ref,
                o_ref, *, h, d_k):
    # Blocks are (1, tq/S, D); index [0] squeezes the leading batch axis.
    cdt = xq_ref.dtype                      # MXU operand dtype (bf16-friendly)
    xq = xq_ref[0]                          # (tq, D)
    xk = xk_ref[0]                          # (S,  D)
    xv = xv_ref[0]                          # (S,  D)

    # Q/K/V projections: full-D matmuls, f32 accumulation, bias broadcast.
    q = jnp.dot(xq, wq_ref[...], preferred_element_type=jnp.float32) + bq_ref[...]
    k = jnp.dot(xk, wk_ref[...], preferred_element_type=jnp.float32) + bk_ref[...]
    v = jnp.dot(xv, wv_ref[...], preferred_element_type=jnp.float32) + bv_ref[...]

    # Fold the 1/sqrt(d_k) scale into q (tq x D) rather than scores (h x tq x S).
    q = (q * (1.0 / math.sqrt(d_k))).astype(cdt)
    k = k.astype(cdt)
    v = v.astype(cdt)

    # Head-major stacks built from static lane slices (trace-time unrolled).
    qh = jnp.stack([q[:, i * d_k:(i + 1) * d_k] for i in range(h)], axis=0)  # (h, tq, d_k)
    kh = jnp.stack([k[:, i * d_k:(i + 1) * d_k] for i in range(h)], axis=0)  # (h, S,  d_k)
    vh = jnp.stack([v[:, i * d_k:(i + 1) * d_k] for i in range(h)], axis=0)  # (h, S,  d_k)

    # Batched attention scores over all heads; contraction on d_k, no explicit K^T.
    scores = jnp.einsum('hqd,hkd->hqk', qh, kh,
                        preferred_element_type=jnp.float32)                  # (h, tq, S)

    # Max-stabilized, UNNORMALIZED softmax; normalization deferred to ctx.
    m = jnp.max(scores, axis=-1, keepdims=True)                              # (h, tq, 1)
    p = jnp.exp(scores - m)                                                  # (h, tq, S)
    l = jnp.sum(p, axis=-1, keepdims=True)                                   # (h, tq, 1)

    ctx = jnp.einsum('hqk,hkd->hqd', p.astype(cdt), vh,
                     preferred_element_type=jnp.float32)                     # (h, tq, d_k)
    ctx = ctx * pl.reciprocal(l, approx=True)       # deferred softmax denom (EUP)

    # Merge heads along lanes and do ONE (tq, D) x (D, D) output projection.
    ctx2d = jnp.concatenate([ctx[i] for i in range(h)], axis=-1).astype(cdt)  # (tq, D)
    out = jnp.dot(ctx2d, wo_ref[...], preferred_element_type=jnp.float32) + bo_ref[...]
    o_ref[0] = out.astype(o_ref.dtype)


def multihead_attention(query, key, value, params, *, h, tq=None):
    """query/key/value: (B, S, d_model). Returns (B, S, d_model)."""
    B, S, D = query.shape
    assert D % h == 0
    d_k = D // h

    wq, bq, wk, bk, wv, bv, wo, bo = params
    # Biases as (1, D) f32 tiles so they broadcast onto the f32 accumulators.
    bq2, bk2, bv2, bo2 = (b.reshape(1, D).astype(jnp.float32)
                          for b in (bq, bk, bv, bo))

    # Query-sequence tile; full S when small (toy shapes -> grid (B, 1)).
    if tq is None:
        tq = S if S <= 256 else 256
    n_q = (S + tq - 1) // tq

    kernel = functools.partial(_mha_kernel, h=h, d_k=d_k)

    q_spec = pl.BlockSpec((1, tq, D), lambda b, qi: (b, qi, 0))
    kv_spec = pl.BlockSpec((1, S, D), lambda b, qi: (b, 0, 0))
    w_spec = pl.BlockSpec((D, D), lambda b, qi: (0, 0))
    b_spec = pl.BlockSpec((1, D), lambda b, qi: (0, 0))

    # Advisory cost estimate so XLA schedules around the custom call sensibly.
    itemsize = query.dtype.itemsize
    flops = 8 * B * S * D * D + 4 * B * S * S * D          # 4 projections + QK^T + PV
    transcendentals = B * h * S * S                        # exp (+ tiny recip count)
    bytes_accessed = (4 * B * S * D) * itemsize \
        + 4 * D * D * wq.dtype.itemsize + 4 * D * 4

    return pl.pallas_call(
        kernel,
        out_shape=jax.ShapeDtypeStruct((B, S, D), query.dtype),
        grid_spec=pltpu.PrefetchScalarGridSpec(
            num_scalar_prefetch=0,
            grid=(B, n_q),
            in_specs=[q_spec, kv_spec, kv_spec,
                      w_spec, b_spec, w_spec, b_spec, w_spec, b_spec,
                      w_spec, b_spec],
            out_specs=pl.BlockSpec((1, tq, D), lambda b, qi: (b, qi, 0)),
        ),
        compiler_params=pltpu.CompilerParams(
            # Both axes independent -> megacore / v7x dual-TC sharding.
            dimension_semantics=("parallel", "parallel"),
            # Explicit scoped-VMEM budget; stays under v7x's 64 MiB physical.
            vmem_limit_bytes=48 * 1024 * 1024,
        ),
        cost_estimate=pl.CostEstimate(
            flops=flops,
            transcendentals=transcendentals,
            bytes_accessed=bytes_accessed),
    )(query, key, value, wq, bq2, wk, bk2, wv, bv2, wo, bo2)


def multihead_attention_ref(query, key, value, params, *, h):
    """Pure-JAX reference mirroring the PyTorch forward (dropout = identity)."""
    B, S, D = query.shape
    d_k = D // h
    wq, bq, wk, bk, wv, bv, wo, bo = params

    def proj(x, w, b):
        return x @ w + b

    def split_heads(x):
        return x.reshape(B, S, h, d_k).transpose(0, 2, 1, 3)  # (B, h, S, d_k)

    q = split_heads(proj(query, wq, bq))
    k = split_heads(proj(key, wk, bk))
    v = split_heads(proj(value, wv, bv))

    scores = jnp.einsum("bhqd,bhkd->bhqk", q, k) / math.sqrt(d_k)
    p = jax.nn.softmax(scores, axis=-1)
    ctx = jnp.einsum("bhqk,bhkd->bhqd", p, v)
    ctx = ctx.transpose(0, 2, 1, 3).reshape(B, S, D)
    return ctx @ wo + bo


def init_params(key, d_model):
    """Deterministic PyTorch-Linear-style init: U(-1/sqrt(in), 1/sqrt(in))."""
    bound = 1.0 / math.sqrt(d_model)
    keys = jax.random.split(key, 8)
    params = []
    for i in range(4):
        w = jax.random.uniform(keys[2 * i], (d_model, d_model),
                               jnp.float32, -bound, bound)
        b = jax.random.uniform(keys[2 * i + 1], (d_model,),
                               jnp.float32, -bound, bound)
        params += [w, b]
    return tuple(params)


if __name__ == "__main__":
    B, S, d_model, h = 2, 8, 32, 4

    root = jax.random.PRNGKey(0)
    kp, kq, kk, kv = jax.random.split(root, 4)
    params = init_params(kp, d_model)

    query = jax.random.normal(kq, (B, S, d_model), jnp.float32)
    key = jax.random.normal(kk, (B, S, d_model), jnp.float32)
    value = jax.random.normal(kv, (B, S, d_model), jnp.float32)

    out = multihead_attention(query, key, value, params, h=h)
    out = jax.block_until_ready(out)

    ref = multihead_attention_ref(query, key, value, params, h=h)
    assert out.shape == (B, S, d_model)
    # approx=True reciprocal (EUP) slightly loosens the tolerance vs exact divide.
    assert jnp.allclose(out, ref, atol=2e-3, rtol=2e-3), "mismatch vs reference"

    print("KERNEL_OK")
</pallas_src>

<mosaic_0001>
module attributes {stable_mosaic.version = 11 : i64} {
  func.func @_mha_kernel(%arg0: i32, %arg1: i32, %arg2: memref<1x8x32xf32, #tpu.memory_space<vmem>>, %arg3: memref<1x8x32xf32, #tpu.memory_space<vmem>>, %arg4: memref<1x8x32xf32, #tpu.memory_space<vmem>>, %arg5: memref<32x32xf32, #tpu.memory_space<vmem>>, %arg6: memref<1x32xf32, #tpu.memory_space<vmem>>, %arg7: memref<32x32xf32, #tpu.memory_space<vmem>>, %arg8: memref<1x32xf32, #tpu.memory_space<vmem>>, %arg9: memref<32x32xf32, #tpu.memory_space<vmem>>, %arg10: memref<1x32xf32, #tpu.memory_space<vmem>>, %arg11: memref<32x32xf32, #tpu.memory_space<vmem>>, %arg12: memref<1x32xf32, #tpu.memory_space<vmem>>, %arg13: memref<1x8x32xf32, #tpu.memory_space<vmem>>) attributes {dimension_semantics = [#tpu.dimension_semantics<parallel>, #tpu.dimension_semantics<parallel>], iteration_bounds = array<i64: 2, 1>, scalar_prefetch = 0 : i64, scratch_operands = 0 : i64, tpu.core_type = #tpu.core_type<tc>, window_params = [{transform_indices = @transform_0, window_bounds = array<i64: 1, 8, 32>}, {transform_indices = @transform_1, window_bounds = array<i64: 1, 8, 32>}, {transform_indices = @transform_2, window_bounds = array<i64: 1, 8, 32>}, {pipeline_mode = #tpu.pipeline_mode<synchronous>, transform_indices = @transform_3, window_bounds = array<i64: 32, 32>}, {pipeline_mode = #tpu.pipeline_mode<synchronous>, transform_indices = @transform_4, window_bounds = array<i64: 1, 32>}, {pipeline_mode = #tpu.pipeline_mode<synchronous>, transform_indices = @transform_5, window_bounds = array<i64: 32, 32>}, {pipeline_mode = #tpu.pipeline_mode<synchronous>, transform_indices = @transform_6, window_bounds = array<i64: 1, 32>}, {pipeline_mode = #tpu.pipeline_mode<synchronous>, transform_indices = @transform_7, window_bounds = array<i64: 32, 32>}, {pipeline_mode = #tpu.pipeline_mode<synchronous>, transform_indices = @transform_8, window_bounds = array<i64: 1, 32>}, {pipeline_mode = #tpu.pipeline_mode<synchronous>, transform_indices = @transform_9, window_bounds = array<i64: 32, 32>}, {pipeline_mode = #tpu.pipeline_mode<synchronous>, transform_indices = @transform_10, window_bounds = array<i64: 1, 32>}, {transform_indices = @transform_11, window_bounds = array<i64: 1, 8, 32>}]} {
    %c0 = arith.constant 0 : index
    %c0_0 = arith.constant 0 : index
    %c0_1 = arith.constant 0 : index
    %0 = vector.load %arg2[%c0, %c0_0, %c0_1] : memref<1x8x32xf32, #tpu.memory_space<vmem>>, vector<1x8x32xf32>
    %1 = vector.shape_cast %0 : vector<1x8x32xf32> to vector<8x32xf32>
    %c0_2 = arith.constant 0 : index
    %c0_3 = arith.constant 0 : index
    %c0_4 = arith.constant 0 : index
    %2 = vector.load %arg3[%c0_2, %c0_3, %c0_4] : memref<1x8x32xf32, #tpu.memory_space<vmem>>, vector<1x8x32xf32>
    %3 = vector.shape_cast %2 : vector<1x8x32xf32> to vector<8x32xf32>
    %c0_5 = arith.constant 0 : index
    %c0_6 = arith.constant 0 : index
    %c0_7 = arith.constant 0 : index
    %4 = vector.load %arg4[%c0_5, %c0_6, %c0_7] : memref<1x8x32xf32, #tpu.memory_space<vmem>>, vector<1x8x32xf32>
    %5 = vector.shape_cast %4 : vector<1x8x32xf32> to vector<8x32xf32>
    %c0_8 = arith.constant 0 : index
    %c0_9 = arith.constant 0 : index
    %6 = vector.load %arg5[%c0_8, %c0_9] : memref<32x32xf32, #tpu.memory_space<vmem>>, vector<32x32xf32>
    %cst = arith.constant dense<0.000000e+00> : vector<8x32xf32>
    %7 = tpu.matmul %1, %6, %cst {dimension_numbers = #tpu.dot_dimension_numbers<[1], [0], [0], [1], [0, 0, 1, 1], [], []>} : vector<8x32xf32>, vector<32x32xf32>, vector<8x32xf32> -> vector<8x32xf32>
    %c0_10 = arith.constant 0 : index
    %c0_11 = arith.constant 0 : index
    %8 = vector.load %arg6[%c0_10, %c0_11] : memref<1x32xf32, #tpu.memory_space<vmem>>, vector<1x32xf32>
    %9 = vector.broadcast %8 : vector<1x32xf32> to vector<8x32xf32>
    %10 = arith.addf %7, %9 : vector<8x32xf32>
    %c0_12 = arith.constant 0 : index
    %c0_13 = arith.constant 0 : index
    %11 = vector.load %arg7[%c0_12, %c0_13] : memref<32x32xf32, #tpu.memory_space<vmem>>, vector<32x32xf32>
    %cst_14 = arith.constant dense<0.000000e+00> : vector<8x32xf32>
    %12 = tpu.matmul %3, %11, %cst_14 {dimension_numbers = #tpu.dot_dimension_numbers<[1], [0], [0], [1], [0, 0, 1, 1], [], []>} : vector<8x32xf32>, vector<32x32xf32>, vector<8x32xf32> -> vector<8x32xf32>
    %c0_15 = arith.constant 0 : index
    %c0_16 = arith.constant 0 : index
    %13 = vector.load %arg8[%c0_15, %c0_16] : memref<1x32xf32, #tpu.memory_space<vmem>>, vector<1x32xf32>
    %14 = vector.broadcast %13 : vector<1x32xf32> to vector<8x32xf32>
    %15 = arith.addf %12, %14 : vector<8x32xf32>
    %c0_17 = arith.constant 0 : index
    %c0_18 = arith.constant 0 : index
    %16 = vector.load %arg9[%c0_17, %c0_18] : memref<32x32xf32, #tpu.memory_space<vmem>>, vector<32x32xf32>
    %cst_19 = arith.constant dense<0.000000e+00> : vector<8x32xf32>
    %17 = tpu.matmul %5, %16, %cst_19 {dimension_numbers = #tpu.dot_dimension_numbers<[1], [0], [0], [1], [0, 0, 1, 1], [], []>} : vector<8x32xf32>, vector<32x32xf32>, vector<8x32xf32> -> vector<8x32xf32>
    %c0_20 = arith.constant 0 : index
    %c0_21 = arith.constant 0 : index
    %18 = vector.load %arg10[%c0_20, %c0_21] : memref<1x32xf32, #tpu.memory_space<vmem>>, vector<1x32xf32>
    %19 = vector.broadcast %18 : vector<1x32xf32> to vector<8x32xf32>
    %20 = arith.addf %17, %19 : vector<8x32xf32>
    %cst_22 = arith.constant 0.353553385 : f32
    %21 = vector.broadcast %cst_22 : f32 to vector<8x32xf32>
    %22 = arith.mulf %10, %21 : vector<8x32xf32>
    %23 = vector.extract_strided_slice %22 {offsets = [0, 0], sizes = [8, 8], strides = [1, 1]} : vector<8x32xf32> to vector<8x8xf32>
    %24 = vector.extract_strided_slice %22 {offsets = [0, 8], sizes = [8, 8], strides = [1, 1]} : vector<8x32xf32> to vector<8x8xf32>
    %25 = vector.extract_strided_slice %22 {offsets = [0, 16], sizes = [8, 8], strides = [1, 1]} : vector<8x32xf32> to vector<8x8xf32>
    %26 = vector.extract_strided_slice %22 {offsets = [0, 24], sizes = [8, 8], strides = [1, 1]} : vector<8x32xf32> to vector<8x8xf32>
    %27 = vector.shape_cast %23 : vector<8x8xf32> to vector<1x8x8xf32>
    %28 = vector.shape_cast %24 : vector<8x8xf32> to vector<1x8x8xf32>
    %29 = vector.shape_cast %25 : vector<8x8xf32> to vector<1x8x8xf32>
    %30 = vector.shape_cast %26 : vector<8x8xf32> to vector<1x8x8xf32>
    %31 = tpu.concatenate %27, %28, %29, %30 in 0 : vector<1x8x8xf32>, vector<1x8x8xf32>, vector<1x8x8xf32>, vector<1x8x8xf32> -> vector<4x8x8xf32>
    %32 = vector.extract_strided_slice %15 {offsets = [0, 0], sizes = [8, 8], strides = [1, 1]} : vector<8x32xf32> to vector<8x8xf32>
    %33 = vector.extract_strided_slice %15 {offsets = [0, 8], sizes = [8, 8], strides = [1, 1]} : vector<8x32xf32> to vector<8x8xf32>
    %34 = vector.extract_strided_slice %15 {offsets = [0, 16], sizes = [8, 8], strides = [1, 1]} : vector<8x32xf32> to vector<8x8xf32>
    %35 = vector.extract_strided_slice %15 {offsets = [0, 24], sizes = [8, 8], strides = [1, 1]} : vector<8x32xf32> to vector<8x8xf32>
    %36 = vector.shape_cast %32 : vector<8x8xf32> to vector<1x8x8xf32>
    %37 = vector.shape_cast %33 : vector<8x8xf32> to vector<1x8x8xf32>
    %38 = vector.shape_cast %34 : vector<8x8xf32> to vector<1x8x8xf32>
    %39 = vector.shape_cast %35 : vector<8x8xf32> to vector<1x8x8xf32>
    %40 = tpu.concatenate %36, %37, %38, %39 in 0 : vector<1x8x8xf32>, vector<1x8x8xf32>, vector<1x8x8xf32>, vector<1x8x8xf32> -> vector<4x8x8xf32>
    %41 = vector.extract_strided_slice %20 {offsets = [0, 0], sizes = [8, 8], strides = [1, 1]} : vector<8x32xf32> to vector<8x8xf32>
    %42 = vector.extract_strided_slice %20 {offsets = [0, 8], sizes = [8, 8], strides = [1, 1]} : vector<8x32xf32> to vector<8x8xf32>
    %43 = vector.extract_strided_slice %20 {offsets = [0, 16], sizes = [8, 8], strides = [1, 1]} : vector<8x32xf32> to vector<8x8xf32>
    %44 = vector.extract_strided_slice %20 {offsets = [0, 24], sizes = [8, 8], strides = [1, 1]} : vector<8x32xf32> to vector<8x8xf32>
    %45 = vector.shape_cast %41 : vector<8x8xf32> to vector<1x8x8xf32>
    %46 = vector.shape_cast %42 : vector<8x8xf32> to vector<1x8x8xf32>
    %47 = vector.shape_cast %43 : vector<8x8xf32> to vector<1x8x8xf32>
    %48 = vector.shape_cast %44 : vector<8x8xf32> to vector<1x8x8xf32>
    %49 = tpu.concatenate %45, %46, %47, %48 in 0 : vector<1x8x8xf32>, vector<1x8x8xf32>, vector<1x8x8xf32>, vector<1x8x8xf32> -> vector<4x8x8xf32>
    "tpu.trace_start"() <{level = 10 : i32, message = "hqd,hkd->hqk"}> : () -> ()
    %cst_23 = arith.constant dense<0.000000e+00> : vector<4x8x8xf32>
    %50 = tpu.matmul %31, %40, %cst_23 {dimension_numbers = #tpu.dot_dimension_numbers<[2], [2], [1], [1], [0, 0, 0, 1, 1, 1], [0], [0]>} : vector<4x8x8xf32>, vector<4x8x8xf32>, vector<4x8x8xf32> -> vector<4x8x8xf32>
    "tpu.trace_stop"() : () -> ()
    %cst_24 = arith.constant dense<0xFF800000> : vector<4x8xf32>
    %51 = vector.multi_reduction <maximumf>, %50, %cst_24 [2] : vector<4x8x8xf32> to vector<4x8xf32>
    %52 = vector.shape_cast %51 : vector<4x8xf32> to vector<4x8x1xf32>
    %53 = vector.broadcast %52 : vector<4x8x1xf32> to vector<4x8x8xf32>
    %54 = arith.subf %50, %53 : vector<4x8x8xf32>
    %55 = math.exp %54 : vector<4x8x8xf32>
    %cst_25 = arith.constant dense<0.000000e+00> : vector<4x8xf32>
    %56 = vector.multi_reduction <add>, %55, %cst_25 [2] : vector<4x8x8xf32> to vector<4x8xf32>
    %57 = vector.shape_cast %56 : vector<4x8xf32> to vector<4x8x1xf32>
    "tpu.trace_start"() <{level = 10 : i32, message = "hqk,hkd->hqd"}> : () -> ()
    %cst_26 = arith.constant dense<0.000000e+00> : vector<4x8x8xf32>
    %58 = tpu.matmul %55, %49, %cst_26 {dimension_numbers = #tpu.dot_dimension_numbers<[2], [1], [1], [2], [0, 0, 0, 1, 1, 2], [0], [0]>} : vector<4x8x8xf32>, vector<4x8x8xf32>, vector<4x8x8xf32> -> vector<4x8x8xf32>
    "tpu.trace_stop"() : () -> ()
    %59 = tpu.reciprocal %57 {approx = true} : vector<4x8x1xf32> -> vector<4x8x1xf32>
    %60 = vector.broadcast %59 : vector<4x8x1xf32> to vector<4x8x8xf32>
    %61 = arith.mulf %58, %60 : vector<4x8x8xf32>
    %62 = vector.extract_strided_slice %61 {offsets = [0, 0, 0], sizes = [1, 8, 8], strides = [1, 1, 1]} : vector<4x8x8xf32> to vector<1x8x8xf32>
    %63 = vector.shape_cast %62 : vector<1x8x8xf32> to vector<8x8xf32>
    %64 = vector.extract_strided_slice %61 {offsets = [1, 0, 0], sizes = [1, 8, 8], strides = [1, 1, 1]} : vector<4x8x8xf32> to vector<1x8x8xf32>
    %65 = vector.shape_cast %64 : vector<1x8x8xf32> to vector<8x8xf32>
    %66 = vector.extract_strided_slice %61 {offsets = [2, 0, 0], sizes = [1, 8, 8], strides = [1, 1, 1]} : vector<4x8x8xf32> to vector<1x8x8xf32>
    %67 = vector.shape_cast %66 : vector<1x8x8xf32> to vector<8x8xf32>
    %68 = vector.extract_strided_slice %61 {offsets = [3, 0, 0], sizes = [1, 8, 8], strides = [1, 1, 1]} : vector<4x8x8xf32> to vector<1x8x8xf32>
    %69 = vector.shape_cast %68 : vector<1x8x8xf32> to vector<8x8xf32>
    %70 = tpu.concatenate %63, %65, %67, %69 in 1 : vector<8x8xf32>, vector<8x8xf32>, vector<8x8xf32>, vector<8x8xf32> -> vector<8x32xf32>
    %c0_27 = arith.constant 0 : index
    %c0_28 = arith.constant 0 : index
    %71 = vector.load %arg11[%c0_27, %c0_28] : memref<32x32xf32, #tpu.memory_space<vmem>>, vector<32x32xf32>
    %cst_29 = arith.constant dense<0.000000e+00> : vector<8x32xf32>
    %72 = tpu.matmul %70, %71, %cst_29 {dimension_numbers = #tpu.dot_dimension_numbers<[1], [0], [0], [1], [0, 0, 1, 1], [], []>} : vector<8x32xf32>, vector<32x32xf32>, vector<8x32xf32> -> vector<8x32xf32>
    %c0_30 = arith.constant 0 : index
    %c0_31 = arith.constant 0 : index
    %73 = vector.load %arg12[%c0_30, %c0_31] : memref<1x32xf32, #tpu.memory_space<vmem>>, vector<1x32xf32>
    %74 = vector.broadcast %73 : vector<1x32xf32> to vector<8x32xf32>
    %75 = arith.addf %72, %74 : vector<8x32xf32>
    %c0_32 = arith.constant 0 : index
    %c0_33 = arith.constant 0 : index
    %c0_34 = arith.constant 0 : index
    %76 = vector.load %arg13[%c0_32, %c0_33, %c0_34] : memref<1x8x32xf32, #tpu.memory_space<vmem>>, vector<1x8x32xf32>
    %77 = vector.shape_cast %76 : vector<1x8x32xf32> to vector<8x32xf32>
    %78 = vector.shape_cast %75 : vector<8x32xf32> to vector<1x8x32xf32>
    tpu.vector_store %arg13[%c0_32, %c0_33, %c0_34], %78 {strides = array<i32>} : memref<1x8x32xf32, #tpu.memory_space<vmem>>, vector<1x8x32xf32>,
    return
  }
  func.func @transform_0(%arg0: i32, %arg1: i32) -> (i32, i32, i32) {
    %c0_i32 = arith.constant 0 : i32
    %c0_i32_0 = arith.constant 0 : i32
    return %arg0, %arg1, %c0_i32 : i32, i32, i32
  }
  func.func @transform_1(%arg0: i32, %arg1: i32) -> (i32, i32, i32) {
    %c0_i32 = arith.constant 0 : i32
    %c0_i32_0 = arith.constant 0 : i32
    %c0_i32_1 = arith.constant 0 : i32
    return %arg0, %c0_i32, %c0_i32_0 : i32, i32, i32
  }
  func.func @transform_2(%arg0: i32, %arg1: i32) -> (i32, i32, i32) {
    %c0_i32 = arith.constant 0 : i32
    %c0_i32_0 = arith.constant 0 : i32
    %c0_i32_1 = arith.constant 0 : i32
    return %arg0, %c0_i32, %c0_i32_0 : i32, i32, i32
  }
  func.func @transform_3(%arg0: i32, %arg1: i32) -> (i32, i32) {
    %c0_i32 = arith.constant 0 : i32
    %c0_i32_0 = arith.constant 0 : i32
    %c0_i32_1 = arith.constant 0 : i32
    return %c0_i32, %c0_i32_0 : i32, i32
  }
  func.func @transform_4(%arg0: i32, %arg1: i32) -> (i32, i32) {
    %c0_i32 = arith.constant 0 : i32
    %c0_i32_0 = arith.constant 0 : i32
    %c0_i32_1 = arith.constant 0 : i32
    return %c0_i32, %c0_i32_0 : i32, i32
  }
  func.func @transform_5(%arg0: i32, %arg1: i32) -> (i32, i32) {
    %c0_i32 = arith.constant 0 : i32
    %c0_i32_0 = arith.constant 0 : i32
    %c0_i32_1 = arith.constant 0 : i32
    return %c0_i32, %c0_i32_0 : i32, i32
  }
  func.func @transform_6(%arg0: i32, %arg1: i32) -> (i32, i32) {
    %c0_i32 = arith.constant 0 : i32
    %c0_i32_0 = arith.constant 0 : i32
    %c0_i32_1 = arith.constant 0 : i32
    return %c0_i32, %c0_i32_0 : i32, i32
  }
  func.func @transform_7(%arg0: i32, %arg1: i32) -> (i32, i32) {
    %c0_i32 = arith.constant 0 : i32
    %c0_i32_0 = arith.constant 0 : i32
    %c0_i32_1 = arith.constant 0 : i32
    return %c0_i32, %c0_i32_0 : i32, i32
  }
  func.func @transform_8(%arg0: i32, %arg1: i32) -> (i32, i32) {
    %c0_i32 = arith.constant 0 : i32
    %c0_i32_0 = arith.constant 0 : i32
    %c0_i32_1 = arith.constant 0 : i32
    return %c0_i32, %c0_i32_0 : i32, i32
  }
  func.func @transform_9(%arg0: i32, %arg1: i32) -> (i32, i32) {
    %c0_i32 = arith.constant 0 : i32
    %c0_i32_0 = arith.constant 0 : i32
    %c0_i32_1 = arith.constant 0 : i32
    return %c0_i32, %c0_i32_0 : i32, i32
  }
  func.func @transform_10(%arg0: i32, %arg1: i32) -> (i32, i32) {
    %c0_i32 = arith.constant 0 : i32
    %c0_i32_0 = arith.constant 0 : i32
    %c0_i32_1 = arith.constant 0 : i32
    return %c0_i32, %c0_i32_0 : i32, i32
  }
  func.func @transform_11(%arg0: i32, %arg1: i32) -> (i32, i32, i32) {
    %c0_i32 = arith.constant 0 : i32
    %c0_i32_0 = arith.constant 0 : i32
    return %arg0, %arg1, %c0_i32 : i32, i32, i32
  }
}

</mosaic_0001>

<bundles_post_ra>
// kernel: tpu_custom_call.1
= control target key start
LH: loop header
LB: loop body
LE: loop exit
PB: predicated region body
PF: predicated region fallthrough
CT: control target
= control target key end

     0   :  { %s2924_s0 = inlined_call_operand.hbm [shape: f32[2,8,32], index: 0, kind: input, shape index: {}]   ;;  %s2925_s1 = inlined_call_operand.hbm [shape: f32[2,8,32], index: 1, kind: input, shape index: {}]   ;;  %s2926_s2 = inlined_call_operand.hbm [shape: f32[2,8,32], index: 2, kind: input, shape index: {}]   ;;  %s2927_s3 = inlined_call_operand.hbm [shape: f32[32,32], index: 3, kind: input, shape index: {}]   ;;  %s2928_s4 = inlined_call_operand.vmem [shape: f32[1,32], index: 4, kind: input, shape index: {}]   ;;  %s2929_s5 = inlined_call_operand.hbm [shape: f32[32,32], index: 5, kind: input, shape index: {}]   ;;  %s2930_s6 = inlined_call_operand.vmem [shape: f32[1,32], index: 6, kind: input, shape index: {}]   ;;  %s2931_s7 = inlined_call_operand.hbm [shape: f32[32,32], index: 7, kind: input, shape index: {}]   ;;  %s2932_s8 = inlined_call_operand.hbm [shape: f32[1,32], index: 8, kind: input, shape index: {}]   ;;  %s2933_s9 = inlined_call_operand.vmem [shape: f32[32,32], index: 9, kind: input, shape index: {}]   ;;  %s2934_s10 = inlined_call_operand.vmem [shape: f32[1,32], index: 10, kind: input, shape index: {}]   ;;  %s2935_s11 = inlined_call_operand.hbm [shape: f32[2,8,32], index: 11, kind: output, shape index: {}]  }
   0x1   :  { %2961 = sst [smem:[#allocation28_spill]] %s2925_s1 }
   0x2   :  { %2962 = sst [smem:[#allocation29_spill]] %s2927_s3 }
   0x3   :  { %2963 = sst [smem:[#allocation30_spill]] %s2931_s7 }
   0x4   :  { %2964 = sst [smem:[#allocation31_spill]] %s2933_s9 }
   0x5   :  { %2965 = sst [smem:[#allocation32_spill]] %s2934_s10 }
   0x6   :  { %2966 = sst [smem:[#allocation33_spill]] %s2935_s11 }
   0x7   :  { %16 = vsyncpa [#allocation3], 0 }
   0x8   :  { %18 = vsyncpa [#allocation3 + $0x1], 0 }
   0x9   :  { %19 = vsyncpa [#allocation6], 0 }
   0xa   :  { %21 = vsyncpa [#allocation6 + $0x1], 0 }
   0xb   :  { %22 = vsyncpa [#allocation9], 0 }
   0xc   :  { %23 = vsyncpa [#allocation12], 0 }
   0xd   :  { %24 = vsyncpa [#allocation4], 0 }
   0xe   :  { %26 = vsyncpa [#allocation4 + $0x1], 0  ;;  %s2446_s17 = smov 0   ;;  %s2448_s18 = smov 0  }
   0xf   :  { %s2450_s19 = smov 0   ;;  %s2452_s20 = smov 0  }
  0x10   :  { %s2454_s21 = smov 0   ;;  %s2456_s22 = smov 0  }
  0x11 LB: > { %2967 = sst [smem:[#allocation20_spill]] %s2345_s17  ;;  %s2477_s23 = sadd.s32 4294967295, %s2365_s22   ;;  %s2365_s22 = sphi %s2456_s22, %s32_s22   ;;  %s2361_s21 = sphi %s2454_s21, %s3014_s21   ;;  %s2357_s20 = sphi %s2452_s20, %s3013_s20   ;;  %s2353_s19 = sphi %s2450_s19, %s3017_s19   ;;  %s2349_s18 = sphi %s2448_s18, %s3016_s18   ;;  %s2345_s17 = sphi %s2446_s17, %s3015_s17  }
  0x12   : > { %2968 = sst [smem:[#allocation21_spill]] %s2357_s20  ;;  %p1740_p0 = scmp.ge.s32.totalorder %s2365_s22, 1 }
  0x13   : > { %2969 = sst [smem:[#allocation22_spill]] %s2361_s21  ;;  %p2945_p1 = scmp.eq.s32.totalorder %s2477_s23, 0 }
  0x14   : > { %2970 = sst [smem:[#allocation23_spill]] %s2365_s22  ;;  %p325_p2 = scmp.lt.s32.totalorder %s2365_s22, 3 }
  0x15   : > { %s2367_s25 = smov [#allocation8]   ;;  %s2368_s28 = smov [#allocation11]  }
  0x16   : > { %p2482_p3 = pnand %p1740_p0, %p325_p2  ;;  %s337_s26 = sshll.u32 %s2367_s25, 4  ;;  %s2486_s26 = int_to_ptr.vmem [resolvable:$true] %s337_s26 }
  0x17   : > { %s369_s29 = sshll.u32 %s2368_s28, 4  ;;  %s2973_s3 = sld [smem:[#allocation29_spill]]  ;;  %s2497_s29 = int_to_ptr.vmem [resolvable:$true] %s369_s29 }
  0x18   : > { %s2971_s24 = scalar_select %p2482_p3, 1, 0 }
  0x19   : > { %p1953_p4 = pneg %p2482_p3 }
  0x1b   : > { %p2493_p6 = pnand %p1953_p4, %p2945_p1 }
  0x1d   : > { %s2972_s27 = scalar_select %p2493_p6, 1, 0 }
  0x1e   : > { %s2069_s13 = scalar_lea.hbm %s2973_s3, 512  ;;  %p2507_p8 = pneg %p2493_p6 }
  0x1f   : > { %p2070_p7 = scmp.ne.s32.totalorder %s2973_s3, %s2069_s13  ;;  %p2076_p11 = scmp.lt.u32.totalorder %s2069_s13, %s2973_s3 }
  0x20   : > { %s2974_s16 = scalar_select %p2507_p8, 1, 0 }
  0x21   : > { %p2072_p9 = pnand %p2507_p8, %p2070_p7 }
  0x23   : > { %p2073_p10 = pneg %p2072_p9 }
  0x25   : > { %p2078_p12 = pnand %p2076_p11, %p2073_p10 }
  0x27   : > { %2081 = shalt.err (!%p2078_p12)
}
  0x28   : > { %s2082_s30 = scalar_lea.vmem %s2486_s26, 512  ;;  %p2090_p4 = scmp.lt.s32.totalorder %s2486_s26, %s2486_s26 }
  0x29   : > { %p2083_p13 = scmp.ne.s32.totalorder %s2486_s26, %s2082_s30  ;;  %p2091_p5 = scmp.lt.s32.totalorder %s2082_s30, %s2082_s30 }
  0x2b   : > { %p2085_p0 = pnand %p2083_p13, %p2507_p8  ;;  %p2092_p7 = por %p2091_p5, %p2090_p4 }
  0x2d   : > { %p2086_p2 = pneg %p2085_p0 }
  0x2f   : > { %p2093_p9 = pnand %p2092_p7, %p2086_p2 }
  0x31   : > { %2096 = shalt.err (!%p2093_p9)
}
  0x32   : > { %s2938_s12 = smov 128   ;;  %s2939_s13 = smov 8  }
  0x33   : > { %1956 = dma.hbm_to_vmem [thread:$0]  (!%p2493_p6), %s2973_s3, 512, %s2486_s26, [#allocation9], %s2938_s12, %s2938_s12, %s2939_s13  }
  0x34   : > { %s2975_s7 = sld [smem:[#allocation30_spill]] }
  0x3a   : > { %s2097_s30 = scalar_lea.hbm %s2975_s7, 512 }
  0x3b   : > { %p2098_p5 = scmp.ne.s32.totalorder %s2975_s7, %s2097_s30  ;;  %p2104_p12 = scmp.lt.u32.totalorder %s2097_s30, %s2975_s7 }
  0x3d   : > { %p2100_p10 = pnand %p2098_p5, %p2507_p8 }
  0x3f   : > { %p2101_p11 = pneg %p2100_p10 }
  0x41   : > { %p2106_p13 = pnand %p2104_p12, %p2101_p11 }
  0x43   : > { %2109 = shalt.err (!%p2106_p13)
}
  0x44   : > { %s2110_s26 = scalar_lea.vmem %s2497_s29, 512  ;;  %p2118_p7 = scmp.lt.s32.totalorder %s2497_s29, %s2497_s29 }
  0x45   : > { %p2111_p0 = scmp.ne.s32.totalorder %s2497_s29, %s2110_s26  ;;  %p2119_p9 = scmp.lt.s32.totalorder %s2110_s26, %s2110_s26 }
  0x47   : > { %p2113_p2 = pnand %p2111_p0, %p2507_p8  ;;  %p2120_p5 = por %p2119_p9, %p2118_p7 }
  0x49   : > { %p2114_p4 = pneg %p2113_p2 }
  0x4b   : > { %p2121_p10 = pnand %p2120_p5, %p2114_p4 }
  0x4d   : > { %2124 = shalt.err (!%p2121_p10)
}
  0x4e   : > { %1962 = dma.hbm_to_vmem [thread:$0]  (!%p2493_p6), %s2975_s7, 512, %s2497_s29, [#allocation12], %s2938_s12, %s2938_s12, %s2939_s13  }
  0x4f   : > { %s1739_s11 = sadd.s32 4294967294, %s2365_s22   ;;  %s44_s20 = sadd.s32 1, %s2361_s21 }
  0x50   : > { %p46_p11 = scmp.ge.s32.totalorder %s44_s20, 2  ;;  %s53_s14 = sadd.s32 1, %s2353_s19 }
  0x51   : > { %p60_p12 = scmp.ne.s32.totalorder %s2353_s19, %s2349_s18  ;;  %p61_p13 = scmp.eq.s32.totalorder %s2365_s22, 0 }
  0x52   : > { %s3019_s20 = smov (%p46_p11, %s44_s20), 0  ;;  %p66_p2 = scmp.ne.s32.totalorder %s2349_s18, %s2345_s17 }
  0x53   : > { %2976 = sst [smem:[#allocation24_spill]] %s3019_s20  ;;  %p2565_p0 = por %p61_p13, %p60_p12 }
  0x54   : > { %s48_s29 = ssub.s32 %s2361_s21, %s3019_s20  ;;  %p312_p4 = scmp.eq.s32.totalorder %s2477_s23, 1 }
  0x55   : > { %p51_p7 = scmp.eq.s32.totalorder %s48_s29, 0  ;;  %p2576_p9 = por %p2945_p1, %p66_p2 }
  0x56   : > { %p2580_p5 = por %p312_p4, %p60_p12  ;;  %p318_p10 = scmp.eq.s32.totalorder %s1739_s11, 1 }
  0x57   : > { %s2978_s25 = scalar_select %p2576_p9, 1, 0 }
  0x58   : > { %s2979_s28 = scalar_select %p2580_p5, 1, 0 }
  0x59   : > { %s2585_s30 = scalar_select %p51_p7, %s2353_s19, %s53_s14  }
  0x5a   : > { %2980 = sst [smem:[#allocation25_spill]] %s2979_s28  ;;  %p2587_p11 = por %p318_p10, %p66_p2 }
  0x5b   : > { %2981 = sst [smem:[#allocation26_spill]] %s2585_s30  ;;  %p1984_p13 = scmp.lt.s32.totalorder %s2365_s22, 2 }
  0x5c   : > { %s2982_s26 = scalar_select %p2587_p11, 1, 0 }
  0x5d   : > { %s2940_s9 = sand.u32 1, %s2353_s19   ;;  %s2594_s10 = sshll.u32 %s2361_s21, 7 }
  0x5e   : > { %2983 = sst [smem:[#allocation27_spill]] %s2982_s26  ;;  %s2598_s29 = sshll.u32 %s2940_s9, 3 }
  0x5f   : > { %p2602_p12 = pnand %p1984_p13, %p2565_p0  ;;  %s419_s11 = sand.u32 1, %s2365_s22  }
  0x60   : > { %s2985_s1 = sld [smem:[#allocation28_spill]]  ;;  %s423_s7 = scalar_lea.vmem [#allocation5], %s2598_s29 }
  0x61   : > { %s2984_s12 = scalar_select %p2602_p12, 1, 0 }
  0x62   : > { %s430_s9 = sshll.u32 %s423_s7, 4  ;;  %s2616_s15 = scalar_lea.sflag [#allocation6], %s419_s11  ;;  %s2614_s9 = int_to_ptr.vmem [resolvable:$true] %s430_s9 }
  0x63   : > { %p2622_p2 = pneg %p2602_p12 }
  0x65   : > { %s2986_s21 = scalar_select %p2622_p2, 1, 0 }
  0x66   : > { %s2611_s3 = scalar_lea.hbm %s2985_s1, %s2594_s10  ;;  %s2130_s30 = scalar_lea.hbm %s2985_s1, 256 }
  0x67   : > { %s2125_s20 = scalar_lea.hbm %s2611_s3, 128  ;;  %p2131_p10 = scmp.lt.u32.totalorder %s2611_s3, %s2985_s1 }
  0x68   : > { %p2126_p0 = scmp.ne.s32.totalorder %s2611_s3, %s2125_s20  ;;  %p2132_p13 = scmp.lt.u32.totalorder %s2130_s30, %s2125_s20 }
  0x69   : > { %p2134_p11 = scmp.lt.u32.totalorder %s2125_s20, %s2611_s3 }
  0x6a   : > { %p2128_p4 = pnand %p2622_p2, %p2126_p0  ;;  %p2133_p1 = por %p2132_p13, %p2131_p10 }
  0x6c   : > { %p2129_p7 = pneg %p2128_p4  ;;  %p2135_p5 = por %p2134_p11, %p2133_p1 }
  0x6e   : > { %p2136_p9 = pnand %p2135_p5, %p2129_p7 }
  0x70   : > { %2139 = shalt.err (!%p2136_p9)
}
  0x71   : > { %s2140_s11 = scalar_lea.vmem %s2614_s9, 128  ;;  %s2371_s13 = smov [#allocation5]  }
  0x72   : > { %p2141_p0 = scmp.ne.s32.totalorder %s2614_s9, %s2140_s11  ;;  %s2145_s14 = sshll.u32 %s2371_s13, 4  ;;  %s2146_s14 = int_to_ptr.vmem [resolvable:$false] %s2145_s14 }
  0x73   : > { %s2147_s22 = scalar_lea.vmem %s2146_s14, 256  ;;  %p2148_p6 = scmp.lt.s32.totalorder %s2614_s9, %s2146_s14 }
  0x74   : > { %p2143_p4 = pnand %p2141_p0, %p2622_p2  ;;  %p2149_p8 = scmp.lt.s32.totalorder %s2147_s22, %s2140_s11 }
  0x76   : > { %p2144_p3 = pneg %p2143_p4  ;;  %p2150_p10 = por %p2149_p8, %p2148_p6 }
  0x78   : > { %p2151_p13 = pnand %p2150_p10, %p2144_p3 }
  0x7a   : > { %2154 = shalt.err (!%p2151_p13)
}
  0x7b   : > { %1972 = dma.hbm_to_vmem [thread:$0]  (!%p2602_p12), %s2611_s3, 128, %s2614_s9, %s2616_s15  }
  0x7c   : > { %s2372_s20 = smov [#allocation10]   ;;  %s2373_s7 = smov [#allocation13]  }
  0x7d   : > { %s353_s30 = sshll.u32 %s2372_s20, 4  ;;  %s383_s1 = sshll.u32 %s2373_s7, 4  ;;  %s354_s30 = int_to_ptr.vmem [resolvable:$true] %s353_s30  ;;  %s384_s1 = int_to_ptr.vmem [resolvable:$true] %s383_s1 }
  0x7e   : > { %s2155_s14 = scalar_lea.hbm %s2929_s5, 512  ;;  %p2987_p3 = scmp.ne.s32.totalorder %s2974_s16, 0 }
  0x7f   : > { %p2156_p1 = scmp.ne.s32.totalorder %s2929_s5, %s2155_s14  ;;  %p2162_p9 = scmp.lt.u32.totalorder %s2155_s14, %s2929_s5 }
  0x81   : > { %p2158_p6 = pnand %p2156_p1, %p2987_p3 }
  0x83   : > { %p2159_p8 = pneg %p2158_p6 }
  0x85   : > { %p2164_p5 = pnand %p2162_p9, %p2159_p8 }
  0x87   : > { %2167 = shalt.err (!%p2164_p5)
}
  0x88   : > { %s2168_s3 = scalar_lea.vmem %s354_s30, 512  ;;  %p2176_p4 = scmp.lt.s32.totalorder %s354_s30, %s354_s30 }
  0x89   : > { %p2169_p11 = scmp.ne.s32.totalorder %s354_s30, %s2168_s3  ;;  %p2177_p10 = scmp.lt.s32.totalorder %s2168_s3, %s2168_s3 }
  0x8b   : > { %p2171_p7 = pnand %p2169_p11, %p2987_p3  ;;  %p2178_p13 = por %p2177_p10, %p2176_p4 }
  0x8d   : > { %p2172_p0 = pneg %p2171_p7 }
  0x8f   : > { %p2179_p12 = pnand %p2178_p13, %p2172_p0 }
  0x91   : > { %2182 = shalt.err (!%p2179_p12)
}
  0x92   : > { %p2988_p1 = scmp.ne.s32.totalorder %s2972_s27, 0  ;;  %s2989_s26 = smov 8  }
  0x93   : > { %s2990_s9 = smov 128   ;;  %s2183_s13 = scalar_lea.hbm %s2932_s8, 16 }
  0x94   : > { %1959 = dma.hbm_to_vmem [thread:$0]  (!%p2988_p1), %s2929_s5, 512, %s354_s30, [#allocation9], %s2990_s9, %s2990_s9, %s2989_s26  }
  0x95   : > { %p2184_p6 = scmp.ne.s32.totalorder %s2932_s8, %s2183_s13  ;;  %p2190_p9 = scmp.lt.u32.totalorder %s2183_s13, %s2932_s8 }
  0x97   : > { %p2186_p12 = pnand %p2184_p6, %p2987_p3 }
  0x99   : > { %p2187_p8 = pneg %p2186_p12 }
  0x9b   : > { %p2192_p5 = pnand %p2190_p9, %p2187_p8 }
  0x9d   : > { %2195 = shalt.err (!%p2192_p5)
}
  0x9e   : > { %s2196_s17 = scalar_lea.vmem %s384_s1, 16  ;;  %s2203_s30 = scalar_lea.vmem %s384_s1, 32 }
  0x9f   : > { %p2197_p11 = scmp.ne.s32.totalorder %s384_s1, %s2196_s17  ;;  %p2204_p4 = scmp.lt.s32.totalorder %s384_s1, %s384_s1 }
  0xa0   : > { %p2205_p10 = scmp.lt.s32.totalorder %s2203_s30, %s2196_s17 }
  0xa1   : > { %p2199_p7 = pnand %p2197_p11, %p2987_p3 }
  0xa2   : > { %p2206_p13 = por %p2205_p10, %p2204_p4 }
  0xa3   : > { %p2200_p0 = pneg %p2199_p7 }
  0xa5   : > { %p2207_p2 = pnand %p2206_p13, %p2200_p0 }
  0xa7   : > { %2210 = shalt.err (!%p2207_p2)
}
  0xa8   : > { %1965 = dma.hbm_to_vmem [thread:$0]  (!%p2988_p1), %s2932_s8, 16, %s384_s1, [#allocation12]  }
  0xa9   : > { %s2689_s20 = scalar_lea.hbm %s2924_s0, %s2594_s10  ;;  %s404_s7 = scalar_lea.vmem [#allocation2], %s2598_s29 }
  0xaa   : > { %s412_s27 = sshll.u32 %s404_s7, 4  ;;  %s2698_s11 = scalar_lea.hbm %s2926_s2, %s2594_s10  ;;  %s2692_s27 = int_to_ptr.vmem [resolvable:$true] %s412_s27 }
  0xab   : > { %s2991_s22 = sand.u32 1, %s2353_s19   ;;  %s2211_s3 = scalar_lea.hbm %s2689_s20, 128 }
  0xac   : > { %s401_s1 = scalar_lea.sflag [#allocation3], %s2991_s22  ;;  %p2212_p2 = scmp.ne.s32.totalorder %s2689_s20, %s2211_s3 }
  0xad   : > { %p2992_p3 = scmp.ne.s32.totalorder %s2986_s21, 0  ;;  %s2216_s26 = scalar_lea.hbm %s2924_s0, 256 }
  0xae   : > { %p2217_p12 = scmp.lt.u32.totalorder %s2689_s20, %s2924_s0  ;;  %p2218_p8 = scmp.lt.u32.totalorder %s2216_s26, %s2211_s3 }
  0xaf   : > { %p2214_p1 = pnand %p2212_p2, %p2992_p3  ;;  %p2220_p5 = scmp.lt.u32.totalorder %s2211_s3, %s2689_s20 }
  0xb0   : > { %p2219_p9 = por %p2218_p8, %p2217_p12 }
  0xb1   : > { %p2215_p6 = pneg %p2214_p1 }
  0xb2   : > { %p2221_p11 = por %p2220_p5, %p2219_p9 }
  0xb4   : > { %p2222_p7 = pnand %p2221_p11, %p2215_p6 }
  0xb6   : > { %2225 = shalt.err (!%p2222_p7)
}
  0xb7   : > { %s2226_s10 = scalar_lea.vmem %s2692_s27, 128  ;;  %s2374_s28 = smov [#allocation2]  }
  0xb8   : > { %p2227_p0 = scmp.ne.s32.totalorder %s2692_s27, %s2226_s10  ;;  %s2231_s7 = sshll.u32 %s2374_s28, 4  ;;  %s2232_s7 = int_to_ptr.vmem [resolvable:$false] %s2231_s7 }
  0xb9   : > { %s2233_s13 = scalar_lea.vmem %s2232_s7, 256  ;;  %p2234_p13 = scmp.lt.s32.totalorder %s2692_s27, %s2232_s7 }
  0xba   : > { %p2229_p4 = pnand %p2227_p0, %p2992_p3  ;;  %p2235_p2 = scmp.lt.s32.totalorder %s2233_s13, %s2226_s10 }
  0xbc   : > { %p2230_p10 = pneg %p2229_p4  ;;  %p2236_p1 = por %p2235_p2, %p2234_p13 }
  0xbe   : > { %p2237_p12 = pnand %p2236_p1, %p2230_p10 }
  0xc0   : > { %2240 = shalt.err (!%p2237_p12)
}
  0xc1   : > { %p2993_p6 = scmp.ne.s32.totalorder %s2984_s12, 0  ;;  %s441_s14 = scalar_lea.vmem [#allocation7], %s2598_s29 }
  0xc2   : > { %s448_s22 = sshll.u32 %s441_s14, 4  ;;  %s2241_s3 = scalar_lea.hbm %s2698_s11, 128  ;;  %s449_s22 = int_to_ptr.vmem [resolvable:$true] %s448_s22 }
  0xc3   : > { %1969 = dma.hbm_to_vmem [thread:$0]  (!%p2993_p6), %s2689_s20, 128, %s2692_s27, %s401_s1  }
  0xc4   : > { %p2242_p8 = scmp.ne.s32.totalorder %s2698_s11, %s2241_s3  ;;  %s2246_s26 = scalar_lea.hbm %s2926_s2, 256 }
  0xc5   : > { %p2247_p11 = scmp.lt.u32.totalorder %s2698_s11, %s2926_s2  ;;  %p2248_p7 = scmp.lt.u32.totalorder %s2246_s26, %s2241_s3 }
  0xc6   : > { %p2244_p9 = pnand %p2242_p8, %p2992_p3  ;;  %p2250_p4 = scmp.lt.u32.totalorder %s2241_s3, %s2698_s11 }
  0xc7   : > { %p2249_p0 = por %p2248_p7, %p2247_p11 }
  0xc8   : > { %p2245_p5 = pneg %p2244_p9 }
  0xc9   : > { %p2251_p10 = por %p2250_p4, %p2249_p0 }
  0xcb   : > { %p2252_p13 = pnand %p2251_p10, %p2245_p5 }
  0xcd   : > { %2255 = shalt.err (!%p2252_p13)
}
  0xce   : > { %s2256_s29 = scalar_lea.vmem %s449_s22, 128  ;;  %s2375_s20 = smov [#allocation7]  }
  0xcf   : > { %p2257_p2 = scmp.ne.s32.totalorder %s449_s22, %s2256_s29  ;;  %s2261_s27 = sshll.u32 %s2375_s20, 4  ;;  %s2262_s27 = int_to_ptr.vmem [resolvable:$false] %s2261_s27 }
  0xd0   : > { %s2263_s1 = scalar_lea.vmem %s2262_s27, 256  ;;  %p2264_p8 = scmp.lt.s32.totalorder %s449_s22, %s2262_s27 }
  0xd1   : > { %p2259_p1 = pnand %p2257_p2, %p2992_p3  ;;  %p2265_p9 = scmp.lt.s32.totalorder %s2263_s1, %s2256_s29 }
  0xd3   : > { %p2260_p12 = pneg %p2259_p1  ;;  %p2266_p6 = por %p2265_p9, %p2264_p8 }
  0xd5   : > { %p2267_p7 = pnand %p2266_p6, %p2260_p12 }
  0xd7   : > { %2270 = shalt.err (!%p2267_p7)
}
  0xd8   : > { %p2994_p11 = scmp.ne.s32.totalorder %s2984_s12, 0  ;;  %p2995_p5 = scmp.ne.s32.totalorder %s2971_s24, 0 }
  0xd9   : > { %s2745_s21 = sand.u32 (!%p2995_p5), 1, %s2349_s18   ;;  %p2996_p3 = scmp.ne.s32.totalorder (!%p2995_p5), %s2978_s25, 0 }
  0xda   : > { %1975 = dma.hbm_to_vmem [thread:$0]  (!%p2994_p11), %s2698_s11, 128, %s449_s22, %s2616_s15  }
  0xdb   : > { %457 = sbr.rel (%p2995_p5) target bundleno = 1518 (0x5ee), region = 64  ;;  %s2748_s10 = sshll.u32 (!%p2995_p5), %s2745_s21, 3 }
  0xdc   : > { %s460_s28 = scalar_lea.sflag (!%p2995_p5), [#allocation3], %s2745_s21  ;;  %s463_s7 = scalar_lea.vmem (!%p2995_p5), [#allocation2], %s2748_s10 }
  0xe2   : > { %2324 = dma.done.wait (%p2996_p3), %s460_s28, 128  }
  0xe3   : > { %2326 = vsyncadd (%p2996_p3), %s460_s28, 4294967168  ;;  %s468_s24 = sand.u32 1, %s2477_s23   ;;  %s472_s15 = scalar_lea.vmem [#allocation5], %s2748_s10 }
  0xe4   : > { %s469_s12 = scalar_lea.sflag [#allocation6], %s468_s24 }
  0xe5   : > { %2328 = dma.done.wait (%p2996_p3), %s469_s12, 256  }
  0xe6   : > { %2330 = vsyncadd (%p2996_p3), %s469_s12, 4294967040  ;;  %s481_s11 = scalar_lea.vmem [#allocation7], %s2748_s10  ;;  %p2997_p6 = scmp.eq.s32.totalorder %s2477_s23, 0 }
  0xe8   : > { %2332 = dma.done.wait (%p2997_p6), [#allocation9], 1024   ;;  %p2998_p0 = pmov %p2997_p6 }
  0xea   : > { %2334 = vsyncadd (%p2998_p0), [#allocation9], 4294966272  ;;  %p2999_p4 = pmov %p2998_p0 }
  0xeb   : > { %p3000_p10 = pmov %p2998_p0 }
  0xec   : > { %2336 = dma.done.wait (%p2999_p4), [#allocation12], 528  }
  0xed   : > { %2338 = vsyncadd (%p3000_p10), [#allocation12], 4294966768  ;;  %v2376_v0 = vmov 0.0|0.0   ;;  %vm2377_vm0 = vmmov 0   ;;  %v2378_v1 = vmov 0.0   ;;  %v634_v2 = vld [vmem:[#allocation10] sm:$0xff] }
  0xee   : > { %1911 = vmatprep.subr.bf16.mxu1 %v2376_v0  ;;  %1905 = vmatprep.subr.bf16.mxu0 %v2376_v0  ;;  %v635_v3 = vld [vmem:[#allocation10 + $0x8] sm:$0xff]  ;;  %v549_v4 = vld [vmem:[#allocation8] sm:$0xff]  ;;  %v636_v7 = vld [vmem:[#allocation10 + $0x10] sm:$0xff]  ;;  %vm560_vm1 = vcmask 261120   ;;  %vm827_vm2 = vcmask 64512   ;;  %s2379_s22 = smov 112  }
  0xef   : > { %1840 = vmatprep.mubr.msk.f32.mxu1 %vm2377_vm0, %v2378_v1  ;;  %1829 = vmatprep.mubr.msk.f32.mxu0 %vm2377_vm0, %v2378_v1  ;;  %v1912_v5 = vpack.c.bf16 %v635_v3, %v634_v2  ;;  %v550_v6 = vld [vmem:[#allocation8 + $0x8] sm:$0xff]  ;;  %v637_v8 = vld [vmem:[#allocation10 + $0x18] sm:$0xff]  ;;  %v551_v10 = vld [vmem:[#allocation8 + $0x10] sm:$0xff]  ;;  %s2380_s3 = smov 120   ;;  %s2381_s17 = smov 104   ;;  %vm1473_vm3 = vcmask 130048  }
  0xf0   : > { %v1906_v9 = vpack.c.bf16 %v550_v6, %v549_v4  ;;  %v552_v11 = vld [vmem:[#allocation8 + $0x18] sm:$0xff]  ;;  %v1915_v12 = vpack.c.bf16 %v637_v8, %v636_v7  ;;  %v547_v14 = vld [vmem:[%s472_s15] sm:$0xff]  ;;  %v720_v18 = vld [vmem:[#allocation11 + $0x10] sm:$0xff]  ;;  %s3001_s9 = sld [smem:[#allocation31_spill]]  ;;  %s2383_s24 = smov 16   ;;  %vm1475_vm4 = vcmask 195584  }
  0xf1   : > { %1913 = vmatpush3.bf16.msra.mxu1 %v1912_v5  ;;  %v1909_v13 = vpack.c.bf16 %v552_v11, %v551_v10  ;;  %v546_v15 = vld [vmem:[%s463_s7] sm:$0xff]  ;;  %v718_v16 = vld [vmem:[#allocation11] sm:$0xff]  ;;  %v719_v17 = vld [vmem:[#allocation11 + $0x8] sm:$0xff]  ;;  %s2382_s7 = smov 8   ;;  %s2384_s12 = smov 24  }
  0xf2   : > { %1907 = vmatpush3.bf16.msra.mxu0 %v1906_v9  ;;  %1914 = vmatprep.subr.bf16.mxu1 %v2376_v0  ;;  %v1918_v19 = vpack.c.bf16 %v719_v17, %v718_v16  ;;  %v721_v20 = vld [vmem:[#allocation11 + $0x18] sm:$0xff]  ;;  %v1763_v23 = vld [vmem:[%s2930_s6] ss:$0 sm:$0xff]  ;;  %v1765_v32 = vld [vmem:[#allocation13] ss:$0 sm:$0xff]  ;;  %s3002_s15 = sld [smem:[#allocation21_spill]] }
  0xf3   : > { %1908 = vmatprep.subr.bf16.mxu0 %v2376_v0  ;;  %v1921_v21 = vpack.c.bf16 %v721_v20, %v720_v18  ;;  %v548_v22 = vld [vmem:[%s481_s11] sm:$0xff]  ;;  %s3003_s11 = sld [smem:[#allocation25_spill]]  ;;  %s3005_s26 = sld [smem:[#allocation33_spill]] }
  0xf4   : > { %v1761_v24 = vld [vmem:[%s2928_s4] ss:$0 sm:$0xff]  ;;  %s3004_s13 = sld [smem:[#allocation32_spill]]  ;;  %s1563_s29 = scalar_lea.sflag [#allocation4], %s2745_s21 }
  0xf5   : > { %1916 = vmatpush3.bf16.msra.mxu1 %v1915_v12 }
  0xf6   : > { %1910 = vmatpush3.bf16.msra.mxu0 %v1909_v13  ;;  %1854 = vmatprep.subr.mxu1 %v2378_v1  ;;  %v1478_v20 = vld [vmem:[%s3001_s9 + $0x8] sm:$0xff] }
  0xf7   : > { %1917 = vmatprep.subr.bf16.mxu0 %v2376_v0 }
  0xf8   : > { %1841 = vmatmul.mubr.msk.f32.vlgmr.msra.gmra.mrb[0].mxu1 %vm560_vm1, %v547_v14  ;;  %s1782_s14 = sshll.u32 %s3002_s15, 7 }
  0xf9   : > { %1830 = vmatmul.mubr.msk.f32.vlgmr.msra.gmra.mrb[0].mxu0 %vm560_vm1, %v546_v15  ;;  %1856 = vmatprep.mubr.msk.f32.mxu1 %vm2377_vm0, %v2378_v1  ;;  %s2874_s16 = scalar_lea.hbm %s3005_s26, %s1782_s14  ;;  %p3006_p2 = scmp.ne.s32.totalorder %s3003_s11, 0 }
  0xfa   : > { %1851 = vmatprep.mubr.msk.f32.mxu0 %vm2377_vm0, %v2378_v1  ;;  %1919 = vmatpush3.bf16.msra.mxu0 %v1918_v19  ;;  %v1477_v19 = vld [vmem:[%s3001_s9] sm:$0xff] }
  0xfb   : > { %1920 = vmatprep.subr.bf16.mxu0 %v2376_v0 }
  0xfe   : > { %1922 = vmatpush3.bf16.msra.mxu0 %v1921_v21  ;;  %v1479_v21 = vld [vmem:[%s3001_s9 + $0x10] sm:$0xff] }
  0xff   : > { %1874 = vmatprep.subr.mxu0 %v2378_v1 }
 0x101   : > { %1852 = vmatmul.mubr.msk.f32.vlgmr.msra.gmra.mrb[2].mxu0 %vm560_vm1, %v548_v22  ;;  %v1480_v22 = vld [vmem:[%s3001_s9 + $0x18] sm:$0xff] }
 0x102   : > { %1876 = vmatprep.mubr.msk.f32.mxu0 %vm2377_vm0, %v2378_v1 }
 0x1cb   : > { %v714_v25 = vpop.f32.mrb[0].mxu1 }
 0x1cc   : > { %v715_v26 = vadd.f32 %v1763_v23, %v714_v25  ;;  %v630_v27 = vpop.f32.mrb[0].mxu0  ;;  %v1842_v28 = vpop.f32.mrb[1].mxu1 }
 0x1cd   : > { %v631_v29 = vadd.f32 %v1761_v24, %v630_v27  ;;  %v1831_v30 = vpop.f32.mrb[1].mxu0  ;;  %v1927_v24 = vpack.c.bf16 %v1480_v22, %v1479_v21 }
 0x1ce   : > { %813 = vrot.lane.b32.xlu1 %v715_v26, %s2379_s22  ;;  %811 = vrot.lane.b32.xlu0 %v715_v26, %s2380_s3 }
 0x1cf   : > { %v802_v31 = vmul.f32 0.35355338, %v631_v29  ;;  %1855 = vmatpush3.xpose.msk.msra.mxu1 %vm827_vm2, %v715_v26 }
 0x1d0   : > { %1859 = vmatprep.subr.mxu1 %v2378_v1 }
 0x1d2   : > { %1857 = vmatmul.mubr.msk.f32.vlgmr.msra.gmra.mrb[2].mxu1 %vm827_vm2, %v802_v31  ;;  %806 = vrot.lane.b32.xlu1 %v802_v31, %s2379_s22 }
 0x1d3   : > { %804 = vrot.lane.b32.xlu0 %v802_v31, %s2380_s3  ;;  %1861 = vmatprep.mubr.msk.f32.mxu1 %vm2377_vm0, %v2378_v1 }
 0x1d4   : > { %v798_v33 = vpop.f32.mrb[2].mxu0 }
 0x1d5   : > { %v799_v34 = vadd.f32 %v1765_v32, %v798_v33  ;;  %v1853_v35 = vpop.f32.mrb[3].mxu0 }
 0x1d6   : > { %808 = vrot.lane.b32.xlu1 %v802_v31, %s2381_s17 }
 0x1d7   : > { %815 = vrot.lane.b32.xlu0 %v715_v26, %s2381_s17  ;;  %1875 = vmatpush3.msra.mxu0 %v799_v34 }
 0x1d8   : > { %1884 = vmatprep.subr.mxu0 %v2378_v1 }
 0x1da   : > { %818 = vrot.lane.b32.xlu1 %v799_v34, %s2380_s3 }
 0x240   : > { %v812_v36 = vpop.permute.xlu0 %811  ;;  %v814_v37 = vpop.permute.xlu1 %813 }
 0x241   : > { %1860 = vmatpush3.xpose.msk.msra.mxu1 %vm827_vm2, %v812_v36 }
 0x242   : > { %1864 = vmatprep.subr.mxu1 %v2378_v1 }
 0x244   : > { %v807_v39 = vpop.permute.xlu1 %806 }
 0x245   : > { %v805_v38 = vpop.permute.xlu0 %804 }
 0x246   : > { %1862 = vmatmul.mubr.msk.f32.vlgmr.msra.gmra.mrb[4].mxu1 %vm827_vm2, %v805_v38 }
 0x247   : > { %1865 = vmatpush3.xpose.msk.msra.mxu1 %vm827_vm2, %v814_v37  ;;  %1866 = vmatprep.mubr.msk.f32.mxu1 %vm2377_vm0, %v2378_v1 }
 0x248   : > { %1869 = vmatprep.subr.mxu1 %v2378_v1  ;;  %v809_v41 = vpop.permute.xlu1 %808 }
 0x249   : > { %v816_v40 = vpop.permute.xlu0 %815 }
 0x24a   : > { %1867 = vmatmul.mubr.msk.f32.vlgmr.msra.gmra.mrb[6].mxu1 %vm827_vm2, %v807_v39 }
 0x24b   : > { %1870 = vmatpush3.xpose.msk.msra.mxu1 %vm827_vm2, %v816_v40  ;;  %1871 = vmatprep.mubr.msk.f32.mxu1 %vm2377_vm0, %v2378_v1 }
 0x24c   : > { %1879 = vmatprep.subr.mxu1 %v2378_v1  ;;  %v819_v45 = vpop.permute.xlu1 %818 }
 0x24e   : > { %1872 = vmatmul.mubr.msk.f32.vlgmr.msra.gmra.mrb[8].mxu1 %vm827_vm2, %v809_v41 }
 0x24f   : > { %1881 = vmatprep.mubr.msk.f32.mxu1 %vm2377_vm0, %v2378_v1  ;;  %1880 = vmatpush3.msra.mxu1 %v819_v45  ;;  %v1779_v45 = vld [vmem:[%s3004_s13] ss:$0 sm:$0xff] }
 0x250   : > { %1889 = vmatprep.subr.mxu1 %v2378_v1 }
 0x2a5   : > { %v898_v42 = vpop.f32.mrb[2].mxu1 }
 0x2a6   : > { %v1858_v43 = vpop.f32.mrb[3].mxu1  ;;  %v1124_v44 = vsel %vm827_vm2, %v898_v42, -inf }
 0x2a7   : > { %1125 = vmax.xlane.f32.xlu0 %v1124_v44 }
 0x319   : > { %v972_v46 = vpop.f32.mrb[4].mxu1 }
 0x31a   : > { %v1863_v47 = vpop.f32.mrb[5].mxu1  ;;  %v1127_v48 = vsel %vm827_vm2, %v972_v46, -inf }
 0x31b   : > { %1128 = vmax.xlane.f32.xlu1 %v1127_v48 }
 0x31d   : > { %v1046_v49 = vpop.f32.mrb[6].mxu1 }
 0x31e   : > { %v1868_v50 = vpop.f32.mrb[7].mxu1  ;;  %v1130_v51 = vsel %vm827_vm2, %v1046_v49, -inf }
 0x31f   : > { %1131 = vmax.xlane.f32.xlu0 %v1130_v51 }
 0x321   : > { %v1120_v52 = vpop.f32.mrb[8].mxu1 }
 0x322   : > { %v1873_v53 = vpop.f32.mrb[9].mxu1  ;;  %v1133_v54 = vsel %vm827_vm2, %v1120_v52, -inf }
 0x323   : > { %1134 = vmax.xlane.f32.xlu0 %v1133_v54 }
 0x32c   : > { %824 = vrot.lane.b32.xlu1 %v799_v34, %s2381_s17 }
 0x334   : > { %v1126_v55 = vpop.xlane.xlu0 %1125 }
 0x335   : > { %v1136_v56 = vsub.f32 %v898_v42, %v1126_v55 }
 0x337   : > { %v1140_v57 = vmul.f32 1.442695, %v1136_v56 }
 0x339   : > { %2053 = vpow2.f32 %v1140_v57  ;;  %821 = vrot.lane.b32.xlu0 %v799_v34, %s2379_s22  ;;  %s545_s22 = scalar_lea.vmem [#allocation14], %s2748_s10  ;;  %s2385_s10 = smov [#allocation14]  }
 0x33a   : > { %s1577_s3 = sshll.u32 %s545_s22, 4  ;;  %s2275_s27 = sshll.u32 %s2385_s10, 4  ;;  %s2876_s3 = int_to_ptr.vmem [resolvable:$true] %s1577_s3  ;;  %s2276_s27 = int_to_ptr.vmem [resolvable:$false] %s2275_s27 }
 0x33b   : > { %s2271_s20 = scalar_lea.vmem %s2876_s3, 128  ;;  %s2277_s1 = scalar_lea.vmem %s2276_s27, 256 }
 0x33c   : > { %p2272_p13 = scmp.ne.s32.totalorder %s2876_s3, %s2271_s20  ;;  %p2278_p8 = scmp.lt.s32.totalorder %s2876_s3, %s2276_s27 }
 0x33d   : > { %p2279_p9 = scmp.lt.s32.totalorder %s2277_s1, %s2271_s20 }
 0x33e   : > { %p2273_p1 = pnand %p2272_p13, %p3006_p2 }
 0x33f   : > { %p2280_p7 = por %p2279_p9, %p2278_p8 }
 0x340   : > { %p2274_p12 = pneg %p2273_p1 }
 0x342   : > { %p2281_p11 = pnand %p2280_p7, %p2274_p12 }
 0x343   : > { %v2054_v58 = vpop.eup %2053 }
 0x344   : > { %1877 = vmatmul.mubr.msk.f32.vlgmr.msra.gmra.mrb[4].mxu0 %vm827_vm2, %v2054_v58  ;;  %v1148_v12 = vsel %vm827_vm2, %v2054_v58, 0.0 }
 0x345   : > { %1886 = vmatprep.mubr.msk.f32.mxu0 %vm2377_vm0, %v2378_v1 }
 0x3a8   : > { %v1129_v59 = vpop.xlane.xlu1 %1128 }
 0x3a9   : > { %v1137_v60 = vsub.f32 %v972_v46, %v1129_v59 }
 0x3ab   : > { %v1142_v61 = vmul.f32 1.442695, %v1137_v60 }
 0x3ac   : > { %v1132_v62 = vpop.xlane.xlu0 %1131  ;;  %v825_v8 = vpop.permute.xlu1 %824 }
 0x3ad   : > { %2055 = vpow2.f32 %v1142_v61  ;;  %v1138_v63 = vsub.f32 %v1046_v49, %v1132_v62 }
 0x3af   : > { %v1144_v2 = vmul.f32 1.442695, %v1138_v63 }
 0x3b0   : > { %v1135_v3 = vpop.xlane.xlu0 %1134 }
 0x3b1   : > { %2057 = vpow2.f32 %v1144_v2  ;;  %v1139_v4 = vsub.f32 %v1120_v52, %v1135_v3 }
 0x3b3   : > { %v1146_v5 = vmul.f32 1.442695, %v1139_v4 }
 0x3b4   : > { %v822_v6 = vpop.permute.xlu0 %821 }
 0x3b5   : > { %2059 = vpow2.f32 %v1146_v5  ;;  %1885 = vmatpush3.msra.mxu0 %v822_v6 }
 0x3b6   : > { %1923 = vmatprep.subr.bf16.mxu0 %v2376_v0 }
 0x3b7   : > { %v2056_v7 = vpop.eup %2055 }
 0x3b8   : > { %1882 = vmatmul.mubr.msk.f32.vlgmr.msra.gmra.mrb[10].mxu1 %vm827_vm2, %v2056_v7  ;;  %v1151_v9 = vsel %vm827_vm2, %v2056_v7, 0.0 }
 0x3b9   : > { %1890 = vmatpush3.msra.mxu1 %v825_v8  ;;  %1152 = vadd.xlane.f32.xlu1 %v1151_v9 }
 0x3ba   : > { %1891 = vmatprep.mubr.msk.f32.mxu1 %vm2377_vm0, %v2378_v1 }
 0x3bb   : > { %v2058_v10 = vpop.eup %2057 }
 0x3bc   : > { %1887 = vmatmul.mubr.msk.f32.vlgmr.msra.gmra.mrb[6].mxu0 %vm827_vm2, %v2058_v10  ;;  %v1154_v11 = vsel %vm827_vm2, %v2058_v10, 0.0 }
 0x3bd   : > { %1155 = vadd.xlane.f32.xlu0 %v1154_v11  ;;  %1149 = vadd.xlane.f32.xlu1 %v1148_v12 }
 0x3be   : > { %1902 = vmatprep.mubr.msk.f32.mxu0 %vm2377_vm0, %v2378_v1  ;;  %v1924_v1 = vpack.c.bf16 %v1478_v20, %v1477_v19 }
 0x3bf   : > { %v2060_v13 = vpop.eup %2059 }
 0x3c0   : > { %1892 = vmatmul.mubr.msk.f32.vlgmr.msra.gmra.mrb[12].mxu1 %vm827_vm2, %v2060_v13  ;;  %v1157_v14 = vsel %vm827_vm2, %v2060_v13, 0.0  ;;  %1925 = vmatpush3.bf16.msra.mxu0 %v1924_v1 }
 0x3c1   : > { %1158 = vadd.xlane.f32.xlu0 %v1157_v14  ;;  %1926 = vmatprep.subr.bf16.mxu0 %v2376_v0 }
 0x3c4   : > { %1928 = vmatpush3.bf16.msra.mxu0 %v1927_v24 }
 0x417   : > { %v1229_v15 = vpop.f32.mrb[4].mxu0 }
 0x418   : > { %v1878_v16 = vpop.f32.mrb[5].mxu0 }
 0x446   : > { %v1153_v17 = vpop.xlane.xlu1 %1152 }
 0x447   : > { %2061 = vrcp.f32 %v1153_v17 }
 0x44a   : > { %v1156_v18 = vpop.xlane.xlu0 %1155  ;;  %v1150_v36 = vpop.xlane.xlu1 %1149 }
 0x44b   : > { %2063 = vrcp.f32 %v1156_v18 }
 0x44e   : > { %v1159_v23 = vpop.xlane.xlu0 %1158 }
 0x44f   : > { %2065 = vrcp.f32 %v1159_v23 }
 0x450   : > { %2067 = vrcp.f32 %v1150_v36 }
 0x451   : > { %v2062_v25 = vpop.eup %2061 }
 0x455   : > { %v2064_v29 = vpop.eup %2063 }
 0x459   : > { %v2066_v32 = vpop.eup %2065 }
 0x45a   : > { %v2068_v37 = vpop.eup %2067 }
 0x45b   : > { %v1456_v40 = vmul.f32 %v2068_v37, %v1229_v15 }
 0x48b   : > { %v1302_v26 = vpop.f32.mrb[10].mxu1 }
 0x48c   : > { %v1457_v27 = vmul.f32 %v2062_v25, %v1302_v26  ;;  %v1883_v28 = vpop.f32.mrb[11].mxu1 }
 0x48e   : > { %1461 = vrot.lane.b32.xlu0 %v1457_v27, %s2382_s7 }
 0x48f   : > { %v1375_v0 = vpop.f32.mrb[6].mxu0 }
 0x490   : > { %v1458_v30 = vmul.f32 %v2064_v29, %v1375_v0  ;;  %v1888_v31 = vpop.f32.mrb[7].mxu0 }
 0x492   : > { %1465 = vrot.lane.b32.xlu1 %v1458_v30, %s2383_s24 }
 0x493   : > { %v1448_v33 = vpop.f32.mrb[12].mxu1 }
 0x494   : > { %v1459_v34 = vmul.f32 %v2066_v32, %v1448_v33  ;;  %v1893_v35 = vpop.f32.mrb[13].mxu1 }
 0x496   : > { %1469 = vrot.lane.b32.xlu1 %v1459_v34, %s2384_s12 }
 0x500   : > { %v1462_v38 = vpop.permute.xlu0 %1461 }
 0x501   : > { %v1472_v41 = vsel %vm827_vm2, %v1456_v40, %v1462_v38 }
 0x504   : > { %v1466_v39 = vpop.permute.xlu1 %1465 }
 0x505   : > { %v1474_v42 = vsel %vm1473_vm3, %v1472_v41, %v1466_v39 }
 0x508   : > { %v1470_v43 = vpop.permute.xlu1 %1469 }
 0x509   : > { %v1476_v44 = vsel %vm1475_vm4, %v1474_v42, %v1470_v43 }
 0x50a   : > { %1903 = vmatmul.mubr.msk.f32.vlgmr.msra.gmra.mrb[8].mxu0 %vm560_vm1, %v1476_v44 }
 0x5dd   : > { %v1557_v46 = vpop.f32.mrb[8].mxu0 }
 0x5de   : > { %v1558_v47 = vadd.f32 %v1779_v45, %v1557_v46  ;;  %v1904_v48 = vpop.f32.mrb[9].mxu0 }
 0x5e0   : > { %1561 = vst.msk [vmem:[%s545_s22] sm:$0xff] %vm560_vm1, %v1558_v47 }
 0x5e1   : > { %2284 = shalt.err (!%p2281_p11)
}
 0x5e2   : > { %s2285_s21 = scalar_lea.hbm %s2874_s16, 128  ;;  %s2289_s24 = scalar_lea.hbm %s3005_s26, 256 }
 0x5e3   : > { %p2286_p5 = scmp.ne.s32.totalorder %s2874_s16, %s2285_s21  ;;  %p2290_p0 = scmp.lt.u32.totalorder %s2874_s16, %s3005_s26 }
 0x5e4   : > { %p2291_p4 = scmp.lt.u32.totalorder %s2289_s24, %s2285_s21  ;;  %p2293_p13 = scmp.lt.u32.totalorder %s2285_s21, %s2874_s16 }
 0x5e5   : > { %p2287_p3 = pnand %p2286_p5, %p3006_p2 }
 0x5e6   : > { %p2292_p10 = por %p2291_p4, %p2290_p0 }
 0x5e7   : > { %p2288_p6 = pneg %p2287_p3 }
 0x5e8   : > { %p2294_p1 = por %p2293_p13, %p2292_p10 }
 0x5ea   : > { %p2295_p12 = pnand %p2294_p1, %p2288_p6 }
 0x5ec   : > { %2298 = shalt.err (!%p2295_p12)
}
 0x5ed   : > { %1951 = dma.vmem_to_hbm [thread:$0]  (%p3006_p2), %s2876_s3, 128, %s2874_s16, %s1563_s29  }
 0x5ee PF: > { %s3007_s23 = sld [smem:[#allocation20_spill]]  ;;  %s3008_s25 = sld [smem:[#allocation27_spill]] }
 0x5ef   : > { %s3009_s13 = sld [smem:[#allocation23_spill]] }
 0x5f4   : > { %s1589_s14 = sand.u32 1, %s3007_s23   ;;  %p3010_p8 = scmp.ne.s32.totalorder %s3008_s25, 0 }
 0x5f5   : > { %p3011_p9 = scmp.ge.s32.totalorder %s3009_s13, 2  ;;  %s1590_s22 = scalar_lea.sflag [#allocation4], %s1589_s14 }
 0x5f7   : > { %p1977_p7 = pnand %p3011_p9, %p3010_p8 }
 0x5f9   : > { %2340 = dma.done.wait (!%p1977_p7), %s1590_s22, 128  }
 0x5fa   : > { %2342 = vsyncadd (!%p1977_p7), %s1590_s22, 4294967168  ;;  %s32_s22 = sadd.s32 1, %s3009_s13   ;;  %s3012_s11 = sld [smem:[#allocation26_spill]] }
 0x5fb   : > { %p29_p11 = scmp.ge.s32.totalorder %s32_s22, 4   ;;  %s3013_s20 = sld [smem:[#allocation22_spill]] }
 0x5fc   : > { %s3014_s21 = sld [smem:[#allocation24_spill]]  ;;  %s3015_s17 = smov %s2349_s18 }
 0x5fd   : > { %s3016_s18 = smov %s2353_s19  ;;  %31 = sbr.rel (!%p29_p11) target bundleno = 17 (0x11), region = 149 }
 0x600   : > { %s3017_s19 = smov %s3012_s11 }
 0x604   :  { %1595 = vsyncpa [#allocation3], 1 }
 0x605   :  { %1597 = vsyncpa [#allocation3 + $0x1], 1 }
 0x606   :  { %1598 = vsyncpa [#allocation6], 1 }
 0x607   :  { %1600 = vsyncpa [#allocation6 + $0x1], 1 }
 0x608   :  { %1601 = vsyncpa [#allocation9], 1 }
 0x609   :  { %1602 = vsyncpa [#allocation12], 1 }
 0x60a   :  { %1603 = vsyncpa [#allocation4], 1 }
 0x60b   :  { %1605 = vsyncpa [#allocation4 + $0x1], 1 }

</bundles_post_ra>
